<compile_context>
chip_gen: v5e
topology: v5e:2x2
jax: 0.10.0
libtpu: 0.0.40
codegen_flags: <defaults>
</compile_context>

<pallas_src>
import jax
import jax.numpy as jnp
from jax.experimental import pallas as pl
from jax.experimental.pallas import tpu as pltpu

MASK_VALUE = -1e30


def _round_up(v, m):
    return ((v + m - 1) // m) * m


def _vmem_capacity_bytes():
    """Physical per-core VMEM (128 MiB v5e/v6e, 64 MiB v7x); safe fallback."""
    try:
        info = pltpu.get_tpu_info()
        cap = getattr(info, "vmem_capacity_bytes", None)
        if cap:
            return int(cap)
    except Exception:
        pass
    return 64 * 1024 * 1024          # conservative: v7x per-TensorCore VMEM


def _tiling(B, L, D, H, itemsize, masked):
    """Pick (batch tile bt, compute chunk cb, #chunks, vmem limit)."""
    sub = max(8, 32 // itemsize)                         # sublane packing of x.dtype
    cap = _vmem_capacity_bytes()
    vmem_limit = min(96 * 1024 * 1024, (cap * 3) // 4)   # 96 MiB v5e/v6e, 48 MiB v7x

    # Fixed VMEM: double-buffered weights + slack for one chunk's f32 intermediates.
    fixed = 2 * (D * H * itemsize + 2 * H * 4) + 4 * 1024 * 1024
    # Per batch row: double-buffered x block (+ mask) + both double-buffered outputs.
    per_b = 2 * L * D * itemsize + 2 * (D + L) * itemsize
    if masked:
        per_b += 2 * L * itemsize
    budget = max(per_b, int(vmem_limit * 0.8) - fixed)
    bt_mem = max(1, budget // per_b)

    # Keep >= 2 grid steps when B allows so ("parallel",) can use both v7x TCs.
    bt_tc = _round_up(max(1, pl.cdiv(B, 2)), sub)

    bt = min(B, bt_mem, bt_tc)
    if bt < B:
        bt = min(B, max(sub, (bt // sub) * sub))         # sublane-aligned (round down)

    # Compute-chunk rows: bound the (cb*L, H) f32 intermediate to ~4 MiB.
    rows = max(sub, min(1024, (4 * 1024 * 1024) // max(1, 4 * H)))
    cb = min(bt, _round_up(max(1, rows // max(1, L)), sub))
    max_chunks = 16                                      # keep the unrolled loop small
    if bt > cb * max_chunks:
        cb = min(bt, _round_up(pl.cdiv(bt, max_chunks), sub))
    if bt > cb and bt % cb:
        bt = (bt // cb) * cb                             # bt a multiple of cb (and sub)
    num_chunks = pl.cdiv(bt, cb)
    return bt, cb, num_chunks, vmem_limit


def _make_kernel(cb, num_chunks, masked):
    def kernel(*refs):
        if masked:
            x_ref, mask_ref, w1t_ref, b1_ref, w2_ref, pooled_ref, attn_ref = refs
        else:
            x_ref, w1t_ref, b1_ref, w2_ref, pooled_ref, attn_ref = refs
            mask_ref = None

        # Weights are tiny and have constant block indices (fetched once, no
        # per-step DMA); load them once outside the chunk loop.
        w1t = w1t_ref[...]                               # (D, H)  x.dtype (MXU operand)
        b1 = b1_ref[...]                                 # (1, H)  f32
        w2 = w2_ref[...]                                 # (1, H)  f32
        L = x_ref.shape[1]
        D = x_ref.shape[2]
        H = w1t.shape[1]

        # Statically-unrolled chunk loop: all offsets are Python constants, and
        # the (cb*L, H) f32 intermediate stays chunk-sized instead of tile-sized.
        for c in range(num_chunks):
            off = c * cb
            xc = x_ref[pl.ds(off, cb)]                   # (cb, L, D)

            # Projection: tall (cb*L, D) @ (D, H) MXU matmul, f32 accumulation.
            # (reshape is a layout no-op whenever L % 8 == 0)
            x2 = xc.reshape(cb * L, D)
            h = jnp.tanh(
                jnp.dot(x2, w1t, preferred_element_type=jnp.float32) + b1)   # (cb*L, H)

            # scores = h @ w2^T as a lane reduction -> lane-dense (cb, L) f32.
            scores = jnp.sum(h.reshape(cb, L, H) * w2, axis=-1)

            if masked:
                m = mask_ref[pl.ds(off, cb), :]          # (cb, L) x.dtype
                scores = jnp.where(m != 0, scores, MASK_VALUE)

            # Softmax over the sequence axis (lane reductions on the XLU).
            smax = jnp.max(scores, axis=-1, keepdims=True)                   # (cb, 1)
            e = jnp.exp(scores - smax)                                       # (cb, L)
            denom = jnp.sum(e, axis=-1, keepdims=True)                       # (cb, 1)
            attn = e * pl.reciprocal(denom, approx=False)                    # (cb, L) f32

            attn_ref[pl.ds(off, cb), :] = attn.astype(attn_ref.dtype)

            # pooled[b, :] = sum_l attn[b, l] * x[b, l, :]   (batched MXU contraction;
            # attn is cast to x.dtype — exact for f32, tiny rounding for bf16 inputs)
            pooled = jnp.einsum(
                "bql,bld->bqd", attn.astype(xc.dtype)[:, None, :], xc,
                preferred_element_type=jnp.float32)                          # (cb, 1, D)
            pooled_ref[pl.ds(off, cb), :] = pooled.reshape(cb, D).astype(pooled_ref.dtype)

    return kernel


@jax.jit
def attention_forward(x, mask, w1, b1, w2):
    """x: (B, L, D); mask: (B, L, 1) / (B, L) / None; w1: (H, D); b1: (H,); w2: (1, H)."""
    B, L, D = x.shape
    H = w1.shape[0]
    masked = mask is not None

    w1t = w1.T.astype(x.dtype)                           # (D, H) MXU operand in x dtype
    b1r = b1.reshape(1, H).astype(jnp.float32)           # (1, H)
    w2r = w2.reshape(1, H).astype(jnp.float32)           # (1, H)

    bt, cb, num_chunks, vmem_limit = _tiling(B, L, D, H, x.dtype.itemsize, masked)
    grid = (pl.cdiv(B, bt),)

    in_specs = [pl.BlockSpec((bt, L, D), lambda b: (b, 0, 0))]       # x
    inputs = [x]
    if masked:
        in_specs.append(pl.BlockSpec((bt, L), lambda b: (b, 0)))     # mask, lane-dense
        inputs.append(mask.reshape(B, L).astype(x.dtype))
    in_specs += [
        pl.BlockSpec((D, H), lambda b: (0, 0)),                      # w1^T (constant index)
        pl.BlockSpec((1, H), lambda b: (0, 0)),                      # b1
        pl.BlockSpec((1, H), lambda b: (0, 0)),                      # w2
    ]
    inputs += [w1t, b1r, w2r]

    # TODO(synk): for production shapes with L or D < 128, a lane-dense staging
    # slab for the outputs would avoid masked partial stores (minor here).
    pooled, attn = pl.pallas_call(
        _make_kernel(cb, num_chunks, masked),
        out_shape=(
            jax.ShapeDtypeStruct((B, D), x.dtype),       # pooled, lane-dense
            jax.ShapeDtypeStruct((B, L), x.dtype),       # attn, lane-dense
        ),
        grid_spec=pltpu.PrefetchScalarGridSpec(
            num_scalar_prefetch=0,
            grid=grid,
            in_specs=in_specs,
            out_specs=[
                pl.BlockSpec((bt, D), lambda b: (b, 0)),
                pl.BlockSpec((bt, L), lambda b: (b, 0)),
            ],
        ),
        compiler_params=pltpu.CompilerParams(
            dimension_semantics=("parallel",),
            vmem_limit_bytes=vmem_limit),
    )(*inputs)

    return pooled, attn.reshape(B, L, 1)


def reference(x, mask, w1, b1, w2):
    """Pure-JAX reference matching the PyTorch forward exactly."""
    attn = jnp.einsum("bld,hd->blh", x, w1) + b1
    attn = jnp.einsum("blh,oh->blo", jnp.tanh(attn), w2)             # (B, L, 1)
    if mask is not None:
        attn = mask * attn + (1.0 - mask) * MASK_VALUE
    attn = jax.nn.softmax(attn, axis=-2)
    pooled = jnp.einsum("bld,blo->bdo", x, attn)[..., 0]             # (B, D)
    return pooled, attn


if __name__ == "__main__":
    def run_case(name, B, L, d_model, hin_d, use_mask, key, tol):
        kx, kw1, kb1, kw2, km = jax.random.split(key, 5)
        x = jax.random.normal(kx, (B, L, d_model), dtype=jnp.float32)
        # Parameter shapes from nn.Linear in Attention.__init__
        w1 = jax.random.normal(kw1, (hin_d, d_model), dtype=jnp.float32) * 0.1  # linear.weight
        b1 = jax.random.normal(kb1, (hin_d,), dtype=jnp.float32) * 0.1          # linear.bias
        w2 = jax.random.normal(kw2, (1, hin_d), dtype=jnp.float32) * 0.1        # W.weight
        if use_mask:
            lengths = jax.random.randint(km, (B,), 1, L + 1)
            mask = (jnp.arange(L)[None, :] < lengths[:, None]
                    ).astype(jnp.float32)[..., None]                            # (B, L, 1)
        else:
            mask = None

        pooled, attn = attention_forward(x, mask, w1, b1, w2)
        jax.block_until_ready((pooled, attn))

        pooled_ref, attn_ref = reference(x, mask, w1, b1, w2)
        assert pooled.shape == (B, d_model) and attn.shape == (B, L, 1), name
        assert jnp.allclose(pooled, pooled_ref, rtol=tol, atol=tol), name
        assert jnp.allclose(attn, attn_ref, rtol=tol, atol=tol), name

    key = jax.random.PRNGKey(0)
    k1, k2, k3, k4 = jax.random.split(key, 4)

    # Small shapes consistent with Attention(hin_d, d_model): masked + mask=None paths.
    run_case("small_masked", B=2, L=8, d_model=32, hin_d=16, use_mask=True, key=k1, tol=1e-5)
    run_case("small_nomask", B=2, L=8, d_model=32, hin_d=16, use_mask=False, key=k2, tol=1e-5)
    # Multiple grid steps + a partial last batch tile (B not a multiple of bt).
    run_case("multi_tile", B=24, L=16, d_model=64, hin_d=32, use_mask=True, key=k3, tol=1e-4)
    # Multiple statically-unrolled compute chunks inside one batch tile.
    run_case("chunked", B=32, L=128, d_model=64, hin_d=32, use_mask=True, key=k4, tol=1e-4)

    print("KERNEL_OK")
</pallas_src>

<mosaic_0001>
module attributes {stable_mosaic.version = 11 : i64} {
  func.func @kernel(%arg0: i32, %arg1: memref<2x8x32xf32, #tpu.memory_space<vmem>>, %arg2: memref<2x8xf32, #tpu.memory_space<vmem>>, %arg3: memref<32x16xf32, #tpu.memory_space<vmem>>, %arg4: memref<1x16xf32, #tpu.memory_space<vmem>>, %arg5: memref<1x16xf32, #tpu.memory_space<vmem>>, %arg6: memref<2x32xf32, #tpu.memory_space<vmem>>, %arg7: memref<2x8xf32, #tpu.memory_space<vmem>>) attributes {dimension_semantics = [#tpu.dimension_semantics<parallel>], iteration_bounds = array<i64: 1>, scalar_prefetch = 0 : i64, scratch_operands = 0 : i64, tpu.core_type = #tpu.core_type<tc>, window_params = [{transform_indices = @transform_0, window_bounds = array<i64: 2, 8, 32>}, {transform_indices = @transform_1, window_bounds = array<i64: 2, 8>}, {pipeline_mode = #tpu.pipeline_mode<synchronous>, transform_indices = @transform_2, window_bounds = array<i64: 32, 16>}, {pipeline_mode = #tpu.pipeline_mode<synchronous>, transform_indices = @transform_3, window_bounds = array<i64: 1, 16>}, {pipeline_mode = #tpu.pipeline_mode<synchronous>, transform_indices = @transform_4, window_bounds = array<i64: 1, 16>}, {transform_indices = @transform_5, window_bounds = array<i64: 2, 32>}, {transform_indices = @transform_6, window_bounds = array<i64: 2, 8>}]} {
    %c0 = arith.constant 0 : index
    %c0_0 = arith.constant 0 : index
    %0 = vector.load %arg3[%c0, %c0_0] : memref<32x16xf32, #tpu.memory_space<vmem>>, vector<32x16xf32>
    %c0_1 = arith.constant 0 : index
    %c0_2 = arith.constant 0 : index
    %1 = vector.load %arg4[%c0_1, %c0_2] : memref<1x16xf32, #tpu.memory_space<vmem>>, vector<1x16xf32>
    %c0_3 = arith.constant 0 : index
    %c0_4 = arith.constant 0 : index
    %2 = vector.load %arg5[%c0_3, %c0_4] : memref<1x16xf32, #tpu.memory_space<vmem>>, vector<1x16xf32>
    %c0_5 = arith.constant 0 : index
    %c0_6 = arith.constant 0 : index
    %c0_7 = arith.constant 0 : index
    %3 = vector.load %arg1[%c0_5, %c0_6, %c0_7] : memref<2x8x32xf32, #tpu.memory_space<vmem>>, vector<2x8x32xf32>
    %4 = vector.shape_cast %3 : vector<2x8x32xf32> to vector<16x32xf32>
    %cst = arith.constant dense<0.000000e+00> : vector<16x16xf32>
    %5 = tpu.matmul %4, %0, %cst {dimension_numbers = #tpu.dot_dimension_numbers<[1], [0], [0], [1], [0, 0, 1, 1], [], []>} : vector<16x32xf32>, vector<32x16xf32>, vector<16x16xf32> -> vector<16x16xf32>
    %6 = vector.broadcast %1 : vector<1x16xf32> to vector<16x16xf32>
    %7 = arith.addf %5, %6 : vector<16x16xf32>
    %8 = math.tanh %7 : vector<16x16xf32>
    %9 = vector.shape_cast %8 : vector<16x16xf32> to vector<2x8x16xf32>
    %10 = vector.shape_cast %2 : vector<1x16xf32> to vector<1x1x16xf32>
    %11 = vector.broadcast %10 : vector<1x1x16xf32> to vector<2x8x16xf32>
    %12 = arith.mulf %9, %11 : vector<2x8x16xf32>
    %cst_8 = arith.constant dense<0.000000e+00> : vector<2x8xf32>
    %13 = vector.multi_reduction <add>, %12, %cst_8 [2] : vector<2x8x16xf32> to vector<2x8xf32>
    %c0_9 = arith.constant 0 : index
    %c0_10 = arith.constant 0 : index
    %14 = vector.load %arg2[%c0_9, %c0_10] : memref<2x8xf32, #tpu.memory_space<vmem>>, vector<2x8xf32>
    %cst_11 = arith.constant 0.000000e+00 : f32
    %15 = vector.broadcast %cst_11 : f32 to vector<2x8xf32>
    %16 = arith.cmpf one, %14, %15 : vector<2x8xf32>
    %cst_12 = arith.constant -1.000000e+30 : f32
    %17 = vector.broadcast %cst_12 : f32 to vector<2x8xf32>
    %18 = arith.select %16, %13, %17 : vector<2x8xi1>, vector<2x8xf32>
    %cst_13 = arith.constant dense<0xFF800000> : vector<2xf32>
    %19 = vector.multi_reduction <maximumf>, %18, %cst_13 [1] : vector<2x8xf32> to vector<2xf32>
    %20 = vector.shape_cast %19 : vector<2xf32> to vector<2x1xf32>
    %21 = vector.broadcast %20 : vector<2x1xf32> to vector<2x8xf32>
    %22 = arith.subf %18, %21 : vector<2x8xf32>
    %23 = math.exp %22 : vector<2x8xf32>
    %cst_14 = arith.constant dense<0.000000e+00> : vector<2xf32>
    %24 = vector.multi_reduction <add>, %23, %cst_14 [1] : vector<2x8xf32> to vector<2xf32>
    %25 = vector.shape_cast %24 : vector<2xf32> to vector<2x1xf32>
    %26 = tpu.reciprocal %25 : vector<2x1xf32> -> vector<2x1xf32>
    %27 = vector.broadcast %26 : vector<2x1xf32> to vector<2x8xf32>
    %28 = arith.mulf %23, %27 : vector<2x8xf32>
    %c0_15 = arith.constant 0 : index
    %c0_16 = arith.constant 0 : index
    %29 = vector.load %arg7[%c0_15, %c0_16] : memref<2x8xf32, #tpu.memory_space<vmem>>, vector<2x8xf32>
    tpu.vector_store %arg7[%c0_15, %c0_16], %28 {strides = array<i32>} : memref<2x8xf32, #tpu.memory_space<vmem>>, vector<2x8xf32>,
    %30 = vector.shape_cast %28 : vector<2x8xf32> to vector<2x1x8xf32>
    "tpu.trace_start"() <{level = 10 : i32, message = "bql,bld->bqd"}> : () -> ()
    %cst_17 = arith.constant dense<0.000000e+00> : vector<2x1x32xf32>
    %31 = tpu.matmul %30, %3, %cst_17 {dimension_numbers = #tpu.dot_dimension_numbers<[2], [1], [1], [2], [0, 0, 0, 1, 1, 2], [0], [0]>} : vector<2x1x8xf32>, vector<2x8x32xf32>, vector<2x1x32xf32> -> vector<2x1x32xf32>
    "tpu.trace_stop"() : () -> ()
    %32 = vector.shape_cast %31 : vector<2x1x32xf32> to vector<2x32xf32>
    %c0_18 = arith.constant 0 : index
    %c0_19 = arith.constant 0 : index
    %33 = vector.load %arg6[%c0_18, %c0_19] : memref<2x32xf32, #tpu.memory_space<vmem>>, vector<2x32xf32>
    tpu.vector_store %arg6[%c0_18, %c0_19], %32 {strides = array<i32>} : memref<2x32xf32, #tpu.memory_space<vmem>>, vector<2x32xf32>,
    return
  }
  func.func @transform_0(%arg0: i32) -> (i32, i32, i32) {
    %c0_i32 = arith.constant 0 : i32
    %c0_i32_0 = arith.constant 0 : i32
    %c0_i32_1 = arith.constant 0 : i32
    return %arg0, %c0_i32, %c0_i32_0 : i32, i32, i32
  }
  func.func @transform_1(%arg0: i32) -> (i32, i32) {
    %c0_i32 = arith.constant 0 : i32
    %c0_i32_0 = arith.constant 0 : i32
    return %arg0, %c0_i32 : i32, i32
  }
  func.func @transform_2(%arg0: i32) -> (i32, i32) {
    %c0_i32 = arith.constant 0 : i32
    %c0_i32_0 = arith.constant 0 : i32
    %c0_i32_1 = arith.constant 0 : i32
    return %c0_i32, %c0_i32_0 : i32, i32
  }
  func.func @transform_3(%arg0: i32) -> (i32, i32) {
    %c0_i32 = arith.constant 0 : i32
    %c0_i32_0 = arith.constant 0 : i32
    %c0_i32_1 = arith.constant 0 : i32
    return %c0_i32, %c0_i32_0 : i32, i32
  }
  func.func @transform_4(%arg0: i32) -> (i32, i32) {
    %c0_i32 = arith.constant 0 : i32
    %c0_i32_0 = arith.constant 0 : i32
    %c0_i32_1 = arith.constant 0 : i32
    return %c0_i32, %c0_i32_0 : i32, i32
  }
  func.func @transform_5(%arg0: i32) -> (i32, i32) {
    %c0_i32 = arith.constant 0 : i32
    %c0_i32_0 = arith.constant 0 : i32
    return %arg0, %c0_i32 : i32, i32
  }
  func.func @transform_6(%arg0: i32) -> (i32, i32) {
    %c0_i32 = arith.constant 0 : i32
    %c0_i32_0 = arith.constant 0 : i32
    return %arg0, %c0_i32 : i32, i32
  }
}

</mosaic_0001>

<bundles_post_ra>
// kernel: attention_forward.1
= control target key start
LH: loop header
LB: loop body
LE: loop exit
PB: predicated region body
PF: predicated region fallthrough
CT: control target
= control target key end

     0   :  { %12 = vsyncpa [#allocation3], 0  ;;  %s350_s0 = inlined_call_operand.vmem [shape: f32[2,8,32], index: 0, kind: input, shape index: {}]   ;;  %s351_s1 = inlined_call_operand.vmem [shape: f32[2,8], index: 1, kind: input, shape index: {}]   ;;  %s352_s2 = inlined_call_operand.vmem [shape: f32[32,16], index: 2, kind: input, shape index: {}]   ;;  %s353_s3 = inlined_call_operand.vmem [shape: f32[1,16], index: 3, kind: input, shape index: {}]   ;;  %s354_s4 = inlined_call_operand.vmem [shape: f32[1,16], index: 4, kind: input, shape index: {}]   ;;  %s355_s5 = inlined_call_operand.hbm [shape: f32[2,32], index: 5, kind: output, shape index: {0}]   ;;  %s356_s6 = inlined_call_operand.hbm [shape: f32[2,8], index: 6, kind: output, shape index: {1}]  }
   0x1   :  { %v27_v0 = vld [vmem:[%s352_s2 + $0x18] sm:$0xff]  ;;  %v26_v1 = vld [vmem:[%s352_s2 + $0x10] sm:$0xff]  ;;  %v30_v2 = vld [vmem:[%s350_s0] sm:$0xff] }
   0x2   :  { %54 = vmatpush.msra.mxu0 %v27_v0  ;;  %207 = vmatpush.msra.mxu3 %v27_v0  ;;  %v31_v3 = vld [vmem:[%s350_s0 + $0x8] sm:$0xff] }
   0x3   :  { %v25_v4 = vld [vmem:[%s352_s2 + $0x8] sm:$0xff]  ;;  %137 = vmatpush.msra.mxu1 %v30_v2  ;;  %159 = vmatpush.msra.mxu2 %v31_v3 }
   0x4   :  { %55 = vmatpush.msra.mxu0 %v26_v1  ;;  %208 = vmatpush.msra.mxu3 %v26_v1 }
   0x5   :  { %13 = vsyncpa [#allocation5], 0  ;;  %v24_v5 = vld [vmem:[%s352_s2] sm:$0xff]  ;;  %vm35_vm0 = vcmask 261120   ;;  %vm72_vm1 = vcmask 130048   ;;  %v83_v19 = vlaneseq  ;;  %vm87_vm2 = vcmask 1041409  }
   0x6   :  { %56 = vmatpush.msra.mxu0 %v25_v4  ;;  %209 = vmatpush.msra.mxu3 %v25_v4  ;;  %v213_v6 = vld [vmem:[%s353_s3] ss:$0 sm:$0xff]  ;;  %vm91_vm4 = vcmask 58368   ;;  %vm119_vm9 = vcmask 64512   ;;  %s189_s14 = sshll.u32 %s356_s6, 4  ;;  %s276_s15 = smov [#allocation2]   ;;  %s190_s14 = int_to_ptr.hbm [resolvable:$true] %s189_s14 }
   0x7   :  { %v214_v10 = vld [vmem:[%s354_s4] ss:$0 sm:$0xff]  ;;  %v84_v20 = vand.u32 127, %v83_v19  ;;  %s176_s16 = sshll.u32 %s276_s15, 4  ;;  %s178_s19 = sshll.u32 %s355_s5, 4  ;;  %vm169_vm10 = vcmask 254976   ;;  %s177_s16 = int_to_ptr.vmem [resolvable:$true] %s176_s16  ;;  %s179_s19 = int_to_ptr.hbm [resolvable:$true] %s178_s19 }
   0x8   :  { %57 = vmatpush.msra.mxu0 %v24_v5  ;;  %210 = vmatpush.msra.mxu3 %v24_v5  ;;  %v79_v21 = vld [vmem:[%s351_s1] sm:$0x3]  ;;  %s275_s1 = smov [#allocation4]  }
   0x9   :  { %203 = vmatmul.msk.f32.vlgmr.msra.gmra.mxu0 %vm35_vm0, %v30_v2  ;;  %204 = vmatmul.msk.f32.vlgmr.msra.gmra.mxu3 %vm35_vm0, %v31_v3  ;;  %vm80_vm3 = vcmp.ne.f32.partialorder %v79_v21, 0.0  ;;  %s187_s4 = sshll.u32 %s275_s1, 4  ;;  %s188_s4 = int_to_ptr.vmem [resolvable:$true] %s187_s4 }
  0x86   :  { %v59_v7 = vpop.f32.mrf.mxu0 }
  0x87   :  { %v60_v8 = vadd.f32 %v213_v6, %v59_v7 }
  0x89   :  { %215 = vtanh.f32 %v60_v8 }
  0x8c   :  { %v62_v9 = vpop.f32.mrf.mxu3 }
  0x8d   :  { %v63_v11 = vadd.f32 %v213_v6, %v62_v9 }
  0x8f   :  { %v216_v12 = vpop.eup %215  ;;  %217 = vtanh.f32 %v63_v11 }
  0x90   :  { %v70_v13 = vmul.f32 %v216_v12, %v214_v10 }
  0x92   :  { %v73_v14 = vsel %vm72_vm1, %v70_v13, 0.0 }
  0x93   :  { %74 = vadd.xlane.f32.xlu0 %v73_v14 }
  0x95   :  { %v218_v15 = vpop.eup %217 }
  0x96   :  { %v71_v16 = vmul.f32 %v218_v15, %v214_v10 }
  0x98   :  { %v76_v17 = vsel %vm72_vm1, %v71_v16, 0.0 }
  0x9b   :  { %77 = vadd.xlane.f32.xlu0 %v76_v17 }
 0x106   :  { %v75_v18 = vpop.xlane.xlu0 %74 }
 0x107   :  { %v85_v23 = vperm.slane %v75_v18, %v84_v20 }
 0x10e   :  { %v78_v22 = vpop.xlane.xlu0 %77 }
 0x10f   :  { %v86_v24 = vperm.slane %v78_v22, %v84_v20 }
 0x111   :  { %v88_v25 = vsel %vm87_vm2, %v86_v24, %v85_v23 }
 0x112   :  { %v90_v26 = vsel %vm80_vm3, %v88_v25, -1e+30 }
 0x113   :  { %v92_v27 = vsel %vm91_vm4, %v90_v26, -inf }
 0x114   :  { %93 = vmax.xlane.f32.xlu1 %v92_v27 }
 0x187   :  { %v94_v28 = vpop.xlane.xlu1 %93 }
 0x188   :  { %v95_v29 = vsub.f32 %v90_v26, %v94_v28 }
 0x18a   :  { %v96_v30 = vmul.f32 1.442695, %v95_v29 }
 0x18c   :  { %219 = vpow2.f32 %v96_v30 }
 0x192   :  { %v220_v31 = vpop.eup %219 }
 0x193   :  { %v98_v32 = vsel %vm91_vm4, %v220_v31, 0.0 }
 0x194   :  { %99 = vadd.xlane.f32.xlu1 %v98_v32 }
 0x207   :  { %v100_v33 = vpop.xlane.xlu1 %99 }
 0x208   :  { %221 = vrcp.f32 %v100_v33  ;;  %v112_v37 = vand.u32 2147483648, %v100_v33  ;;  %v110_v39 = vand.u32 2147483647, %v100_v33  ;;  %vm106_vm6 = vweird.f32 %v100_v33 }
 0x20a   :  { %v113_v41 = vor.u32 1.1754944e-38, %v112_v37  ;;  %vm111_vm8 = vcmp.eq.f32.partialorder %v110_v39, 8.507059e+37 }
 0x20e   :  { %v222_v34 = vpop.eup %221 }
 0x20f   :  { %v102_v35 = vmul.f32 %v222_v34, %v100_v33  ;;  %vm107_vm5 = vweird.f32 %v222_v34 }
 0x210   :  { %vm108_vm7 = vmor %vm106_vm6, %vm107_vm5 }
 0x211   :  { %v103_v36 = vsub.f32 1.0, %v102_v35 }
 0x213   :  { %v104_v38 = vmul.f32 %v222_v34, %v103_v36 }
 0x215   :  { %v105_v40 = vadd.f32 %v222_v34, %v104_v38 }
 0x217   :  { %v109_v42 = vsel %vm108_vm7, %v222_v34, %v105_v40 }
 0x218   :  { %v114_v43 = vsel %vm111_vm8, %v113_v41, %v109_v42 }
 0x219   :  { %v115_v44 = vmul.f32 %v220_v31, %v114_v43 }
 0x21b   :  { %205 = vmatmul.msk.f32.vlgmr.msra.gmra.mxu1 %vm119_vm9, %v115_v44  ;;  %116 = vst.msk [vmem:[#allocation4] sm:$0x3] %vm91_vm4, %v115_v44  ;;  %v118_v45 = vrot.slane %v115_v44, 1 }
 0x21c   :  { %192 = dma.vmem_to_hbm [thread:$0]  %s188_s4, 32, %s190_s14, [#allocation5]  }
 0x21d   :  { %206 = vmatmul.msk.f32.vlgmr.msra.gmra.mxu2 %vm119_vm9, %v118_v45 }
 0x298   :  { %v139_v48 = vpop.f32.mrf.mxu1 }
 0x2a0   :  { %v161_v46 = vpop.f32.mrf.mxu2 }
 0x2a1   :  { %v166_v47 = vrot.slane %v161_v46, 7 }
 0x2a3   :  { %v167_v49 = vsel %vm87_vm2, %v166_v47, %v139_v48 }
 0x2a4   :  { %170 = vst.msk [vmem:[#allocation2] sm:$0x3] %vm169_vm10, %v167_v49 }
 0x2a5   :  { %181 = dma.vmem_to_hbm [thread:$0]  %s177_s16, 32, %s179_s19, [#allocation3]  }
 0x2a6   :  { %271 = dma.done.wait [#allocation3], 32  }
 0x2a7   :  { %272 = vsyncadd [#allocation3], 4294967264 }
 0x2a8   :  { %273 = dma.done.wait [#allocation5], 32  }
 0x2a9   :  { %274 = vsyncadd [#allocation5], 4294967264 }
 0x2aa   :  { %201 = vsyncpa [#allocation3], 1 }
 0x2ab   :  { %202 = vsyncpa [#allocation5], 1 }

</bundles_post_ra>
